<compile_context>
chip_gen: v7x
topology: tpu7x:2x2x1
jax: 0.10.0
libtpu: 0.0.40
codegen_flags: <defaults>
</compile_context>

<pallas_src>
import functools
import numpy as np
import jax
import jax.numpy as jnp
from jax.experimental import pallas as pl
from jax.experimental.pallas import tpu as pltpu

ELEM_COUNT = 83                       # len(ELEM_LIST) in the reference module
ATOM_FDIM = ELEM_COUNT + 6 + 5 + 1    # 95
BOND_FDIM = 5
IN_FDIM = ATOM_FDIM + BOND_FDIM       # 100
MAX_NB = 15
LANE = 128
SUBLANE = 8


def _round_up(x, m):
    return ((x + m - 1) // m) * m


# --------------------------------------------------------------------------- #
# Kernel: one grid step == one molecule.
# --------------------------------------------------------------------------- #
def _jtmpn_mol_kernel(fat_ref, fbd_ref, cnt_bt_ref, cnt_bg_ref, cnt_at_ref,
                      cnt_ag_ref, pool_ref, tmsg_ref, w_i_t_ref, w_h_t_ref,
                      w_oa_t_ref, w_on_t_ref, b_o_ref, out_ref, *, depth):
    relu = lambda x: jnp.maximum(x, 0.0)
    dotf = functools.partial(jnp.dot, preferred_element_type=jnp.float32)

    w_h_t = w_h_t_ref[...]                                  # (Hp, Hp)  f32
    tmsg = tmsg_ref[...]                                    # (Tp, Hp)  f32

    # W_i + ReLU  (binput / initial graph_message)
    binput = dotf(fbd_ref[...], w_i_t_ref[...])             # (MB, Hp)  f32

    # Loop-invariant tree-message gather (hoisted out of the depth loop).
    nei_tree_b = dotf(cnt_bt_ref[...], tmsg)                # (MB, Hp)

    cnt_bg = cnt_bg_ref[...]                                # (MB, MB)  f32

    def body(_, gm):                                        # gm: (MB, Hp) f32
        nei = nei_tree_b + dotf(cnt_bg, gm)                 # gather+sum over in-bonds
        nei = dotf(nei, w_h_t)                              # W_h
        return relu(binput + nei)

    gm = jax.lax.fori_loop(0, depth - 1, body, relu(binput), unroll=True)

    # Atom-level aggregation + W_o applied to cat([fatoms, nei_a]) via split weights.
    nei_a = dotf(cnt_at_ref[...], tmsg) + dotf(cnt_ag_ref[...], gm)     # (MA, Hp)
    atom_h = relu(dotf(fat_ref[...], w_oa_t_ref[...])
                  + dotf(nei_a, w_on_t_ref[...])
                  + b_o_ref[...])                                       # (MA, Hp) f32

    # Mean pooling over the molecule's real atoms; 1/n_atoms pre-folded into pool.
    out_ref[...] = jnp.sum(atom_h * pool_ref[...], axis=0, keepdims=True)


# --------------------------------------------------------------------------- #
# Jitted device wrapper: XLA-side one-hot count build + pallas_call.
# --------------------------------------------------------------------------- #
@functools.partial(jax.jit, static_argnames=("depth",))
def _jtmpn_device(fat, fbd, agl, bgl, pool_w, tmsg, w_i_t, w_h_t,
                  w_oa_t, w_on_t, b_o, *, depth):
    nmol, MA, AFp = fat.shape
    MB, INp = fbd.shape[1], fbd.shape[2]
    Tp, Hp = tmsg.shape

    # counts[r, c] = #{nb : idx[r, nb] == c}; tree part (cols [0, Tp)) and
    # per-molecule bond part (local ids stored at Tp + local, cols [0, MB)).
    # Counts are small integers (<= MAX_NB), exact in f32.
    def counts(idx):
        tree = jax.nn.one_hot(idx, Tp, dtype=jnp.float32).sum(axis=2)
        graph = jax.nn.one_hot(idx - Tp, MB, dtype=jnp.float32).sum(axis=2)
        return tree, graph

    cnt_at, cnt_ag = counts(agl)            # (nmol, MA, Tp), (nmol, MA, MB)
    cnt_bt, cnt_bg = counts(bgl)            # (nmol, MB, Tp), (nmol, MB, MB)

    mol_blk = lambda r, c: pl.BlockSpec((None, r, c), lambda m: (m, 0, 0))
    shared = lambda r, c: pl.BlockSpec((r, c), lambda m: (0, 0))

    out = pl.pallas_call(
        functools.partial(_jtmpn_mol_kernel, depth=depth),
        out_shape=jax.ShapeDtypeStruct((nmol, 1, Hp), jnp.float32),
        grid=(nmol,),
        in_specs=[
            mol_blk(MA, AFp),      # fatoms (padded)
            mol_blk(MB, INp),      # fbonds (padded)
            mol_blk(MB, Tp),       # cnt_b_tree
            mol_blk(MB, MB),       # cnt_b_graph
            mol_blk(MA, Tp),       # cnt_a_tree
            mol_blk(MA, MB),       # cnt_a_graph
            mol_blk(MA, 1),        # pooling weights (1 / n_atoms)
            shared(Tp, Hp),        # tree_message (shared by all molecules)
            shared(INp, Hp),       # W_i^T
            shared(Hp, Hp),        # W_h^T
            shared(AFp, Hp),       # W_o[:, :ATOM_FDIM]^T
            shared(Hp, Hp),        # W_o[:, ATOM_FDIM:]^T
            shared(1, Hp),         # b_o
        ],
        out_specs=pl.BlockSpec((None, 1, Hp), lambda m: (m, 0, 0)),
        compiler_params=pltpu.CompilerParams(
            dimension_semantics=("parallel",),
            vmem_limit_bytes=32 * 1024 * 1024),
    )(fat, fbd, cnt_bt, cnt_bg, cnt_at, cnt_ag,
      pool_w, tmsg, w_i_t, w_h_t, w_oa_t, w_on_t, b_o)
    return out[:, 0, :]


# --------------------------------------------------------------------------- #
# Host wrapper: per-molecule packing / padding (layout glue, same role as
# JTMPN.tensorize).  Done once per batch layout in numpy.
# --------------------------------------------------------------------------- #
def jtmpn_pallas(fatoms, fbonds, agraph, bgraph, tree_message,
                 w_i, w_h, w_o, b_o, scope, depth):
    fatoms = np.asarray(fatoms, np.float32)
    fbonds = np.asarray(fbonds, np.float32)
    agraph = np.asarray(agraph, np.int64)
    bgraph = np.asarray(bgraph, np.int64)
    tree_message = np.asarray(tree_message, np.float32)
    w_i = np.asarray(w_i, np.float32)
    w_h = np.asarray(w_h, np.float32)
    w_o = np.asarray(w_o, np.float32)
    b_o = np.asarray(b_o, np.float32)

    A, Bm, T = fatoms.shape[0], fbonds.shape[0], tree_message.shape[0]
    H = w_i.shape[0]
    nmol = len(scope)

    Hp = _round_up(max(H, LANE), LANE)            # lane-dense hidden dim
    Tp = _round_up(max(T, SUBLANE), SUBLANE)
    AFp = _round_up(ATOM_FDIM, LANE)
    INp = _round_up(IN_FDIM, LANE)

    # Derive per-molecule contiguous bond ranges from agraph + scope: in the
    # tensorize layout every directed bond appears in exactly one in-bond list
    # of an atom of its own molecule, and bonds are appended per molecule.
    bond_scope = []
    b_cur = 0
    for m, (st, le) in enumerate(scope):
        ent = agraph[st:st + le].reshape(-1)
        bids = ent[ent >= T] - T
        b_end = int(bids.max()) + 1 if bids.size else b_cur
        b_end = max(b_end, b_cur)
        if m == nmol - 1:
            b_end = max(b_end, Bm)
        bond_scope.append((b_cur, b_end - b_cur))
        b_cur = b_end

    MA = _round_up(max(max(le for _, le in scope), 1), SUBLANE)
    MB = _round_up(max(max(bl for _, bl in bond_scope), 1), SUBLANE)

    fat_p = np.zeros((nmol, MA, AFp), np.float32)
    fbd_p = np.zeros((nmol, MB, INp), np.float32)
    agl = np.zeros((nmol, MA, MAX_NB), np.int32)
    bgl = np.zeros((nmol, MB, MAX_NB), np.int32)
    pool = np.zeros((nmol, MA, 1), np.float32)

    def remap(idx, b_st):
        # global message index -> per-molecule local index:
        #   [0, T)       : shared tree messages (index 0 keeps the reference's
        #                  message[0] == tree_message[0] padding semantics)
        #   [Tp, Tp+MB)  : this molecule's own bond messages (local ids)
        out = idx.copy()
        isb = out >= T
        out[isb] = out[isb] - T - b_st + Tp
        return out.astype(np.int32)

    for m, ((a_st, a_len), (b_st, b_len)) in enumerate(zip(scope, bond_scope)):
        fat_p[m, :a_len, :ATOM_FDIM] = fatoms[a_st:a_st + a_len]
        fbd_p[m, :b_len, :IN_FDIM] = fbonds[b_st:b_st + b_len]
        agl[m, :a_len] = remap(agraph[a_st:a_st + a_len], b_st)
        bgl[m, :b_len] = remap(bgraph[b_st:b_st + b_len], b_st)
        pool[m, :a_len, 0] = 1.0 / float(max(a_len, 1))   # reciprocal, no divide in-kernel

    # Pre-transposed, zero-padded parameters (H -> Hp lanes).
    w_i_t = np.zeros((INp, Hp), np.float32); w_i_t[:IN_FDIM, :H] = w_i.T
    w_h_t = np.zeros((Hp, Hp), np.float32); w_h_t[:H, :H] = w_h.T
    w_oa_t = np.zeros((AFp, Hp), np.float32); w_oa_t[:ATOM_FDIM, :H] = w_o[:, :ATOM_FDIM].T
    w_on_t = np.zeros((Hp, Hp), np.float32); w_on_t[:H, :H] = w_o[:, ATOM_FDIM:].T
    b_o_p = np.zeros((1, Hp), np.float32); b_o_p[0, :H] = b_o
    tmsg_p = np.zeros((Tp, Hp), np.float32); tmsg_p[:T, :H] = tree_message

    out = _jtmpn_device(fat_p, fbd_p, agl, bgl, pool, tmsg_p, w_i_t, w_h_t,
                        w_oa_t, w_on_t, b_o_p, depth=depth)
    return out[:, :H]


# --------------------------------------------------------------------------- #
# Float64 numpy replica of the PyTorch forward (correctness reference).
# --------------------------------------------------------------------------- #
def jtmpn_reference(fatoms, fbonds, agraph, bgraph, tree_message,
                    w_i, w_h, w_o, b_o, scope, depth):
    f = lambda x: np.asarray(x, np.float64)
    fatoms, fbonds, tree_message = f(fatoms), f(fbonds), f(tree_message)
    w_i, w_h, w_o, b_o = f(w_i), f(w_h), f(w_o), f(b_o)
    agraph = np.asarray(agraph, np.int64)
    bgraph = np.asarray(bgraph, np.int64)

    binput = fbonds @ w_i.T
    gm = np.maximum(binput, 0.0)
    for _ in range(depth - 1):
        message = np.concatenate([tree_message, gm], axis=0)
        nei = message[bgraph].sum(axis=1)
        nei = nei @ w_h.T
        gm = np.maximum(binput + nei, 0.0)
    message = np.concatenate([tree_message, gm], axis=0)
    nei = message[agraph].sum(axis=1)
    ainput = np.concatenate([fatoms, nei], axis=1)
    ah = np.maximum(ainput @ w_o.T + b_o, 0.0)
    return np.stack([ah[st:st + le].sum(axis=0) / le for st, le in scope])


if __name__ == "__main__":
    hidden_size = 32
    depth = 3
    T = 6
    atom_counts = [4, 6]
    bond_counts = [8, 12]
    A = sum(atom_counts)
    Bm = sum(bond_counts)

    # Deterministic graph layout mimicking JTMPN.tensorize: neighbors of a
    # molecule's atoms/bonds are either tree messages (ids 1..T-1, 0 = pad)
    # or directed bonds of the SAME molecule (ids T + global_bond_idx).
    rng = np.random.default_rng(0)
    scope = []
    agraph = np.zeros((A, MAX_NB), np.int64)
    bgraph = np.zeros((Bm, MAX_NB), np.int64)
    a_off = b_off = 0
    for na, nb in zip(atom_counts, bond_counts):
        scope.append((a_off, na))
        cand = np.concatenate([np.arange(1, T), T + b_off + np.arange(nb)])
        for a in range(a_off, a_off + na):
            k = int(rng.integers(2, 7))
            agraph[a, :k] = rng.choice(cand, size=k)
        agraph[a_off, 0] = T + b_off + nb - 1   # molecule's last bond is referenced
        for b in range(b_off, b_off + nb):
            k = int(rng.integers(1, 6))
            bgraph[b, :k] = rng.choice(cand, size=k)
        a_off += na
        b_off += nb

    key = jax.random.PRNGKey(0)
    ks = jax.random.split(key, 8)
    fatoms = jax.random.normal(ks[0], (A, ATOM_FDIM), jnp.float32)
    fbonds = jax.random.normal(ks[1], (Bm, IN_FDIM), jnp.float32)
    tree_message = jax.random.normal(ks[2], (T, hidden_size), jnp.float32)
    w_i = jax.random.normal(ks[3], (hidden_size, IN_FDIM), jnp.float32) * 0.1
    w_h = jax.random.normal(ks[4], (hidden_size, hidden_size), jnp.float32) * 0.1
    w_o = jax.random.normal(ks[5], (hidden_size, ATOM_FDIM + hidden_size), jnp.float32) * 0.1
    b_o = jax.random.normal(ks[6], (hidden_size,), jnp.float32) * 0.1

    out = jtmpn_pallas(fatoms, fbonds, agraph, bgraph, tree_message,
                       w_i, w_h, w_o, b_o, scope, depth)
    out = jax.block_until_ready(out)

    ref = jtmpn_reference(np.asarray(fatoms), np.asarray(fbonds),
                          agraph, bgraph, np.asarray(tree_message),
                          np.asarray(w_i), np.asarray(w_h), np.asarray(w_o),
                          np.asarray(b_o), scope, depth)

    assert out.shape == (len(scope), hidden_size)
    # Kernel runs fully in f32 (counts are exact integers); tolerance leaves
    # headroom for MXU multi-pass f32 matmul rounding across the depth loop.
    np.testing.assert_allclose(np.asarray(out), ref, rtol=2e-2, atol=2e-2)
    print("KERNEL_OK")
</pallas_src>

<mosaic_0001>
module attributes {stable_mosaic.version = 11 : i64} {
  func.func @_jtmpn_mol_kernel(%arg0: i32, %arg1: memref<1x8x128xf32, #tpu.memory_space<vmem>>, %arg2: memref<1x16x128xf32, #tpu.memory_space<vmem>>, %arg3: memref<1x16x8xf32, #tpu.memory_space<vmem>>, %arg4: memref<1x16x16xf32, #tpu.memory_space<vmem>>, %arg5: memref<1x8x8xf32, #tpu.memory_space<vmem>>, %arg6: memref<1x8x16xf32, #tpu.memory_space<vmem>>, %arg7: memref<1x8x1xf32, #tpu.memory_space<vmem>>, %arg8: memref<8x128xf32, #tpu.memory_space<vmem>>, %arg9: memref<128x128xf32, #tpu.memory_space<vmem>>, %arg10: memref<128x128xf32, #tpu.memory_space<vmem>>, %arg11: memref<128x128xf32, #tpu.memory_space<vmem>>, %arg12: memref<128x128xf32, #tpu.memory_space<vmem>>, %arg13: memref<1x128xf32, #tpu.memory_space<vmem>>, %arg14: memref<1x1x128xf32, #tpu.memory_space<vmem>>) attributes {dimension_semantics = [#tpu.dimension_semantics<parallel>], iteration_bounds = array<i64: 2>, scalar_prefetch = 0 : i64, scratch_operands = 0 : i64, tpu.core_type = #tpu.core_type<tc>, window_params = [{transform_indices = @transform_0, window_bounds = array<i64: 1, 8, 128>}, {transform_indices = @transform_1, window_bounds = array<i64: 1, 16, 128>}, {transform_indices = @transform_2, window_bounds = array<i64: 1, 16, 8>}, {transform_indices = @transform_3, window_bounds = array<i64: 1, 16, 16>}, {transform_indices = @transform_4, window_bounds = array<i64: 1, 8, 8>}, {transform_indices = @transform_5, window_bounds = array<i64: 1, 8, 16>}, {transform_indices = @transform_6, window_bounds = array<i64: 1, 8, 1>}, {pipeline_mode = #tpu.pipeline_mode<synchronous>, transform_indices = @transform_7, window_bounds = array<i64: 8, 128>}, {pipeline_mode = #tpu.pipeline_mode<synchronous>, transform_indices = @transform_8, window_bounds = array<i64: 128, 128>}, {pipeline_mode = #tpu.pipeline_mode<synchronous>, transform_indices = @transform_9, window_bounds = array<i64: 128, 128>}, {pipeline_mode = #tpu.pipeline_mode<synchronous>, transform_indices = @transform_10, window_bounds = array<i64: 128, 128>}, {pipeline_mode = #tpu.pipeline_mode<synchronous>, transform_indices = @transform_11, window_bounds = array<i64: 128, 128>}, {pipeline_mode = #tpu.pipeline_mode<synchronous>, transform_indices = @transform_12, window_bounds = array<i64: 1, 128>}, {transform_indices = @transform_13, window_bounds = array<i64: 1, 1, 128>}]} {
    %c0 = arith.constant 0 : index
    %c0_0 = arith.constant 0 : index
    %0 = vector.load %arg10[%c0, %c0_0] : memref<128x128xf32, #tpu.memory_space<vmem>>, vector<128x128xf32>
    %c0_1 = arith.constant 0 : index
    %c0_2 = arith.constant 0 : index
    %1 = vector.load %arg8[%c0_1, %c0_2] : memref<8x128xf32, #tpu.memory_space<vmem>>, vector<8x128xf32>
    %c0_3 = arith.constant 0 : index
    %c0_4 = arith.constant 0 : index
    %c0_5 = arith.constant 0 : index
    %2 = vector.load %arg2[%c0_3, %c0_4, %c0_5] : memref<1x16x128xf32, #tpu.memory_space<vmem>>, vector<1x16x128xf32>
    %3 = vector.shape_cast %2 : vector<1x16x128xf32> to vector<16x128xf32>
    %c0_6 = arith.constant 0 : index
    %c0_7 = arith.constant 0 : index
    %4 = vector.load %arg9[%c0_6, %c0_7] : memref<128x128xf32, #tpu.memory_space<vmem>>, vector<128x128xf32>
    %cst = arith.constant dense<0.000000e+00> : vector<16x128xf32>
    %5 = tpu.matmul %3, %4, %cst {dimension_numbers = #tpu.dot_dimension_numbers<[1], [0], [0], [1], [0, 0, 1, 1], [], []>} : vector<16x128xf32>, vector<128x128xf32>, vector<16x128xf32> -> vector<16x128xf32>
    %c0_8 = arith.constant 0 : index
    %c0_9 = arith.constant 0 : index
    %c0_10 = arith.constant 0 : index
    %6 = vector.load %arg3[%c0_8, %c0_9, %c0_10] : memref<1x16x8xf32, #tpu.memory_space<vmem>>, vector<1x16x8xf32>
    %7 = vector.shape_cast %6 : vector<1x16x8xf32> to vector<16x8xf32>
    %cst_11 = arith.constant dense<0.000000e+00> : vector<16x128xf32>
    %8 = tpu.matmul %7, %1, %cst_11 {dimension_numbers = #tpu.dot_dimension_numbers<[1], [0], [0], [1], [0, 0, 1, 1], [], []>} : vector<16x8xf32>, vector<8x128xf32>, vector<16x128xf32> -> vector<16x128xf32>
    %c0_12 = arith.constant 0 : index
    %c0_13 = arith.constant 0 : index
    %c0_14 = arith.constant 0 : index
    %9 = vector.load %arg4[%c0_12, %c0_13, %c0_14] : memref<1x16x16xf32, #tpu.memory_space<vmem>>, vector<1x16x16xf32>
    %10 = vector.shape_cast %9 : vector<1x16x16xf32> to vector<16x16xf32>
    %cst_15 = arith.constant 0.000000e+00 : f32
    %11 = vector.broadcast %cst_15 : f32 to vector<16x128xf32>
    %12 = arith.maximumf %5, %11 : vector<16x128xf32>
    %c0_i32 = arith.constant 0 : i32
    %cst_16 = arith.constant dense<0.000000e+00> : vector<16x128xf32>
    %13 = tpu.matmul %10, %12, %cst_16 {dimension_numbers = #tpu.dot_dimension_numbers<[1], [0], [0], [1], [0, 0, 1, 1], [], []>} : vector<16x16xf32>, vector<16x128xf32>, vector<16x128xf32> -> vector<16x128xf32>
    %14 = arith.addf %8, %13 : vector<16x128xf32>
    %cst_17 = arith.constant dense<0.000000e+00> : vector<16x128xf32>
    %15 = tpu.matmul %14, %0, %cst_17 {dimension_numbers = #tpu.dot_dimension_numbers<[1], [0], [0], [1], [0, 0, 1, 1], [], []>} : vector<16x128xf32>, vector<128x128xf32>, vector<16x128xf32> -> vector<16x128xf32>
    %16 = arith.addf %5, %15 : vector<16x128xf32>
    %cst_18 = arith.constant 0.000000e+00 : f32
    %17 = vector.broadcast %cst_18 : f32 to vector<16x128xf32>
    %18 = arith.maximumf %16, %17 : vector<16x128xf32>
    %c1_i32 = arith.constant 1 : i32
    %cst_19 = arith.constant dense<0.000000e+00> : vector<16x128xf32>
    %19 = tpu.matmul %10, %18, %cst_19 {dimension_numbers = #tpu.dot_dimension_numbers<[1], [0], [0], [1], [0, 0, 1, 1], [], []>} : vector<16x16xf32>, vector<16x128xf32>, vector<16x128xf32> -> vector<16x128xf32>
    %20 = arith.addf %8, %19 : vector<16x128xf32>
    %cst_20 = arith.constant dense<0.000000e+00> : vector<16x128xf32>
    %21 = tpu.matmul %20, %0, %cst_20 {dimension_numbers = #tpu.dot_dimension_numbers<[1], [0], [0], [1], [0, 0, 1, 1], [], []>} : vector<16x128xf32>, vector<128x128xf32>, vector<16x128xf32> -> vector<16x128xf32>
    %22 = arith.addf %5, %21 : vector<16x128xf32>
    %cst_21 = arith.constant 0.000000e+00 : f32
    %23 = vector.broadcast %cst_21 : f32 to vector<16x128xf32>
    %24 = arith.maximumf %22, %23 : vector<16x128xf32>
    %c0_22 = arith.constant 0 : index
    %c0_23 = arith.constant 0 : index
    %c0_24 = arith.constant 0 : index
    %25 = vector.load %arg5[%c0_22, %c0_23, %c0_24] : memref<1x8x8xf32, #tpu.memory_space<vmem>>, vector<1x8x8xf32>
    %26 = vector.shape_cast %25 : vector<1x8x8xf32> to vector<8x8xf32>
    %cst_25 = arith.constant dense<0.000000e+00> : vector<8x128xf32>
    %27 = tpu.matmul %26, %1, %cst_25 {dimension_numbers = #tpu.dot_dimension_numbers<[1], [0], [0], [1], [0, 0, 1, 1], [], []>} : vector<8x8xf32>, vector<8x128xf32>, vector<8x128xf32> -> vector<8x128xf32>
    %c0_26 = arith.constant 0 : index
    %c0_27 = arith.constant 0 : index
    %c0_28 = arith.constant 0 : index
    %28 = vector.load %arg6[%c0_26, %c0_27, %c0_28] : memref<1x8x16xf32, #tpu.memory_space<vmem>>, vector<1x8x16xf32>
    %29 = vector.shape_cast %28 : vector<1x8x16xf32> to vector<8x16xf32>
    %cst_29 = arith.constant dense<0.000000e+00> : vector<8x128xf32>
    %30 = tpu.matmul %29, %24, %cst_29 {dimension_numbers = #tpu.dot_dimension_numbers<[1], [0], [0], [1], [0, 0, 1, 1], [], []>} : vector<8x16xf32>, vector<16x128xf32>, vector<8x128xf32> -> vector<8x128xf32>
    %31 = arith.addf %27, %30 : vector<8x128xf32>
    %c0_30 = arith.constant 0 : index
    %c0_31 = arith.constant 0 : index
    %c0_32 = arith.constant 0 : index
    %32 = vector.load %arg1[%c0_30, %c0_31, %c0_32] : memref<1x8x128xf32, #tpu.memory_space<vmem>>, vector<1x8x128xf32>
    %33 = vector.shape_cast %32 : vector<1x8x128xf32> to vector<8x128xf32>
    %c0_33 = arith.constant 0 : index
    %c0_34 = arith.constant 0 : index
    %34 = vector.load %arg11[%c0_33, %c0_34] : memref<128x128xf32, #tpu.memory_space<vmem>>, vector<128x128xf32>
    %cst_35 = arith.constant dense<0.000000e+00> : vector<8x128xf32>
    %35 = tpu.matmul %33, %34, %cst_35 {dimension_numbers = #tpu.dot_dimension_numbers<[1], [0], [0], [1], [0, 0, 1, 1], [], []>} : vector<8x128xf32>, vector<128x128xf32>, vector<8x128xf32> -> vector<8x128xf32>
    %c0_36 = arith.constant 0 : index
    %c0_37 = arith.constant 0 : index
    %36 = vector.load %arg12[%c0_36, %c0_37] : memref<128x128xf32, #tpu.memory_space<vmem>>, vector<128x128xf32>
    %cst_38 = arith.constant dense<0.000000e+00> : vector<8x128xf32>
    %37 = tpu.matmul %31, %36, %cst_38 {dimension_numbers = #tpu.dot_dimension_numbers<[1], [0], [0], [1], [0, 0, 1, 1], [], []>} : vector<8x128xf32>, vector<128x128xf32>, vector<8x128xf32> -> vector<8x128xf32>
    %38 = arith.addf %35, %37 : vector<8x128xf32>
    %c0_39 = arith.constant 0 : index
    %c0_40 = arith.constant 0 : index
    %39 = vector.load %arg13[%c0_39, %c0_40] : memref<1x128xf32, #tpu.memory_space<vmem>>, vector<1x128xf32>
    %40 = vector.broadcast %39 : vector<1x128xf32> to vector<8x128xf32>
    %41 = arith.addf %38, %40 : vector<8x128xf32>
    %cst_41 = arith.constant 0.000000e+00 : f32
    %42 = vector.broadcast %cst_41 : f32 to vector<8x128xf32>
    %43 = arith.maximumf %41, %42 : vector<8x128xf32>
    %c0_42 = arith.constant 0 : index
    %c0_43 = arith.constant 0 : index
    %c0_44 = arith.constant 0 : index
    %44 = vector.load %arg7[%c0_42, %c0_43, %c0_44] : memref<1x8x1xf32, #tpu.memory_space<vmem>>, vector<1x8x1xf32>
    %45 = vector.shape_cast %44 : vector<1x8x1xf32> to vector<8x1xf32>
    %46 = vector.broadcast %45 : vector<8x1xf32> to vector<8x128xf32>
    %47 = arith.mulf %43, %46 : vector<8x128xf32>
    %cst_45 = arith.constant dense<0.000000e+00> : vector<128xf32>
    %48 = vector.multi_reduction <add>, %47, %cst_45 [0] : vector<8x128xf32> to vector<128xf32>
    %49 = vector.shape_cast %48 : vector<128xf32> to vector<1x128xf32>
    %c0_46 = arith.constant 0 : index
    %c0_47 = arith.constant 0 : index
    %c0_48 = arith.constant 0 : index
    %50 = vector.load %arg14[%c0_46, %c0_47, %c0_48] : memref<1x1x128xf32, #tpu.memory_space<vmem>>, vector<1x1x128xf32>
    %51 = vector.shape_cast %50 : vector<1x1x128xf32> to vector<1x128xf32>
    %52 = vector.shape_cast %49 : vector<1x128xf32> to vector<1x1x128xf32>
    tpu.vector_store %arg14[%c0_46, %c0_47, %c0_48], %52 {strides = array<i32>} : memref<1x1x128xf32, #tpu.memory_space<vmem>>, vector<1x1x128xf32>,
    return
  }
  func.func @transform_0(%arg0: i32) -> (i32, i32, i32) {
    %c0_i32 = arith.constant 0 : i32
    %c0_i32_0 = arith.constant 0 : i32
    %c0_i32_1 = arith.constant 0 : i32
    return %arg0, %c0_i32, %c0_i32_0 : i32, i32, i32
  }
  func.func @transform_1(%arg0: i32) -> (i32, i32, i32) {
    %c0_i32 = arith.constant 0 : i32
    %c0_i32_0 = arith.constant 0 : i32
    %c0_i32_1 = arith.constant 0 : i32
    return %arg0, %c0_i32, %c0_i32_0 : i32, i32, i32
  }
  func.func @transform_2(%arg0: i32) -> (i32, i32, i32) {
    %c0_i32 = arith.constant 0 : i32
    %c0_i32_0 = arith.constant 0 : i32
    %c0_i32_1 = arith.constant 0 : i32
    return %arg0, %c0_i32, %c0_i32_0 : i32, i32, i32
  }
  func.func @transform_3(%arg0: i32) -> (i32, i32, i32) {
    %c0_i32 = arith.constant 0 : i32
    %c0_i32_0 = arith.constant 0 : i32
    %c0_i32_1 = arith.constant 0 : i32
    return %arg0, %c0_i32, %c0_i32_0 : i32, i32, i32
  }
  func.func @transform_4(%arg0: i32) -> (i32, i32, i32) {
    %c0_i32 = arith.constant 0 : i32
    %c0_i32_0 = arith.constant 0 : i32
    %c0_i32_1 = arith.constant 0 : i32
    return %arg0, %c0_i32, %c0_i32_0 : i32, i32, i32
  }
  func.func @transform_5(%arg0: i32) -> (i32, i32, i32) {
    %c0_i32 = arith.constant 0 : i32
    %c0_i32_0 = arith.constant 0 : i32
    %c0_i32_1 = arith.constant 0 : i32
    return %arg0, %c0_i32, %c0_i32_0 : i32, i32, i32
  }
  func.func @transform_6(%arg0: i32) -> (i32, i32, i32) {
    %c0_i32 = arith.constant 0 : i32
    %c0_i32_0 = arith.constant 0 : i32
    %c0_i32_1 = arith.constant 0 : i32
    return %arg0, %c0_i32, %c0_i32_0 : i32, i32, i32
  }
  func.func @transform_7(%arg0: i32) -> (i32, i32) {
    %c0_i32 = arith.constant 0 : i32
    %c0_i32_0 = arith.constant 0 : i32
    %c0_i32_1 = arith.constant 0 : i32
    return %c0_i32, %c0_i32_0 : i32, i32
  }
  func.func @transform_8(%arg0: i32) -> (i32, i32) {
    %c0_i32 = arith.constant 0 : i32
    %c0_i32_0 = arith.constant 0 : i32
    %c0_i32_1 = arith.constant 0 : i32
    return %c0_i32, %c0_i32_0 : i32, i32
  }
  func.func @transform_9(%arg0: i32) -> (i32, i32) {
    %c0_i32 = arith.constant 0 : i32
    %c0_i32_0 = arith.constant 0 : i32
    %c0_i32_1 = arith.constant 0 : i32
    return %c0_i32, %c0_i32_0 : i32, i32
  }
  func.func @transform_10(%arg0: i32) -> (i32, i32) {
    %c0_i32 = arith.constant 0 : i32
    %c0_i32_0 = arith.constant 0 : i32
    %c0_i32_1 = arith.constant 0 : i32
    return %c0_i32, %c0_i32_0 : i32, i32
  }
  func.func @transform_11(%arg0: i32) -> (i32, i32) {
    %c0_i32 = arith.constant 0 : i32
    %c0_i32_0 = arith.constant 0 : i32
    %c0_i32_1 = arith.constant 0 : i32
    return %c0_i32, %c0_i32_0 : i32, i32
  }
  func.func @transform_12(%arg0: i32) -> (i32, i32) {
    %c0_i32 = arith.constant 0 : i32
    %c0_i32_0 = arith.constant 0 : i32
    %c0_i32_1 = arith.constant 0 : i32
    return %c0_i32, %c0_i32_0 : i32, i32
  }
  func.func @transform_13(%arg0: i32) -> (i32, i32, i32) {
    %c0_i32 = arith.constant 0 : i32
    %c0_i32_0 = arith.constant 0 : i32
    %c0_i32_1 = arith.constant 0 : i32
    return %arg0, %c0_i32, %c0_i32_0 : i32, i32, i32
  }
}

</mosaic_0001>

<bundles_post_ra>
// kernel: _jtmpn_device.1
= control target key start
LH: loop header
LB: loop body
LE: loop exit
PB: predicated region body
PF: predicated region fallthrough
CT: control target
= control target key end

     0   :  { %s2985_s0 = inlined_call_operand.hbm [shape: f32[2,8,128], index: 0, kind: input, shape index: {}]   ;;  %s2986_s1 = inlined_call_operand.hbm [shape: f32[2,16,128], index: 1, kind: input, shape index: {}]   ;;  %s2987_s2 = inlined_call_operand.vmem [shape: f32[2,16,8], index: 2, kind: input, shape index: {}]   ;;  %s2988_s3 = inlined_call_operand.vmem [shape: f32[2,16,16], index: 3, kind: input, shape index: {}]   ;;  %s2989_s4 = inlined_call_operand.vmem [shape: f32[2,8,8], index: 4, kind: input, shape index: {}]   ;;  %s2990_s5 = inlined_call_operand.vmem [shape: f32[2,8,16], index: 5, kind: input, shape index: {}]   ;;  %s2991_s6 = inlined_call_operand.vmem [shape: f32[2,8,1], index: 6, kind: input, shape index: {}]   ;;  %s2992_s7 = inlined_call_operand.hbm [shape: f32[8,128], index: 7, kind: input, shape index: {}]   ;;  %s2993_s8 = inlined_call_operand.vmem [shape: f32[128,128], index: 8, kind: input, shape index: {}]   ;;  %s2994_s9 = inlined_call_operand.vmem [shape: f32[128,128], index: 9, kind: input, shape index: {}]   ;;  %s2995_s10 = inlined_call_operand.vmem [shape: f32[128,128], index: 10, kind: input, shape index: {}]   ;;  %s2996_s11 = inlined_call_operand.vmem [shape: f32[128,128], index: 11, kind: input, shape index: {}]   ;;  %s2997_s12 = inlined_call_operand.vmem [shape: f32[1,128], index: 12, kind: input, shape index: {}]   ;;  %s2998_s13 = inlined_call_operand.hbm [shape: f32[2,1,128], index: 13, kind: output, shape index: {}]  }
   0x1   :  { %3011 = sst [smem:[#allocation19_spill]] %s2992_s7 }
   0x2   :  { %3012 = sst [smem:[#allocation20_spill]] %s2997_s12 }
   0x3   :  { %3013 = sst [smem:[#allocation21_spill]] %s2998_s13 }
   0x4   :  { %18 = vsyncpa [#allocation3], 0 }
   0x5   :  { %20 = vsyncpa [#allocation3 + $0x1], 0 }
   0x6   :  { %21 = vsyncpa [#allocation6], 0 }
   0x7   :  { %23 = vsyncpa [#allocation6 + $0x1], 0 }
   0x8   :  { %24 = vsyncpa [#allocation4], 0 }
   0x9   :  { %26 = vsyncpa [#allocation4 + $0x1], 0  ;;  %s2445_s25 = smov 0   ;;  %s2447_s26 = smov 0  }
   0xa   :  { %s2449_s27 = smov 0   ;;  %s2451_s28 = smov 0  }
   0xb LB: > { %3014 = sst [smem:[#allocation13_spill]] %s2351_s25  ;;  %s2466_s29 = sadd.s32 4294967295, %s2363_s28   ;;  %s2363_s28 = sphi %s2451_s28, %s3043_s28   ;;  %s2359_s27 = sphi %s2449_s27, %s3045_s27   ;;  %s2355_s26 = sphi %s2447_s26, %s3047_s26   ;;  %s2351_s25 = sphi %s2445_s25, %s3046_s25  }
   0xc   : > { %3015 = sst [smem:[#allocation14_spill]] %s2359_s27  ;;  %s1630_s30 = sadd.s32 4294967294, %s2363_s28  }
   0xd   : > { %s2470_s14 = sadd.s32 1, %s2363_s28   ;;  %s39_s15 = sadd.s32 1, %s2359_s27 }
   0xe   : > { %3016 = sst [smem:[#allocation15_spill]] %s2470_s14  ;;  %s36_s16 = ssub.s32 %s2363_s28, %s2470_s14 }
   0xf   : > { %p46_p0 = scmp.ne.s32.totalorder %s2359_s27, %s2355_s26  ;;  %p37_p1 = scmp.eq.s32.totalorder %s36_s16, 0 }
  0x10   : > { %p52_p2 = scmp.ne.s32.totalorder %s2355_s26, %s2351_s25  ;;  %p3007_p3 = scmp.eq.s32.totalorder %s2466_s29, 0 }
  0x11   : > { %p358_p4 = scmp.eq.s32.totalorder %s2466_s29, 1  ;;  %p364_p7 = scmp.eq.s32.totalorder %s1630_s30, 1 }
  0x12   : > { %s2482_s17 = scalar_select %p37_p1, %s2359_s27, %s39_s15  }
  0x13   : > { %p2486_p5 = por %p3007_p3, %p52_p2  ;;  %p2493_p6 = por %p358_p4, %p46_p0 }
  0x14   : > { %3017 = sst [smem:[#allocation16_spill]] %s2482_s17  ;;  %p1631_p8 = scmp.ge.s32.totalorder %s2363_s28, 1 }
  0x15   : > { %s3018_s18 = scalar_select %p2486_p5, 1, 0 }
  0x16   : > { %s3019_s19 = scalar_select %p2493_p6, 1, 0 }
  0x17   : > { %p371_p9 = scmp.lt.s32.totalorder %s2363_s28, 3  ;;  %p2499_p10 = por %p364_p7, %p52_p2 }
  0x18   : > { %3020 = sst [smem:[#allocation17_spill]] %s3019_s19  ;;  %s2365_s22 = smov [#allocation7]  }
  0x19   : > { %s3021_s20 = scalar_select %p2499_p10, 1, 0 }
  0x1a   : > { %p2503_p11 = pnand %p1631_p8, %p371_p9  ;;  %s384_s23 = sshll.u32 %s2365_s22, 4  ;;  %s385_s23 = int_to_ptr.vmem [resolvable:$true] %s384_s23 }
  0x1b   : > { %3022 = sst [smem:[#allocation18_spill]] %s3021_s20  ;;  %p47_p1 = scmp.eq.s32.totalorder %s2363_s28, 0 }
  0x1c   : > { %s3023_s21 = scalar_select %p2503_p11, 1, 0 }
  0x1d   : > { %p2142_p13 = pneg %p2503_p11  ;;  %s2513_s24 = sand.u32 1, %s2359_s27  }
  0x1e   : > { %p2524_p7 = por %p47_p1, %p46_p0  ;;  %s1634_s16 = sshll.u32 %s2513_s24, 3 }
  0x1f   : > { %p2517_p2 = pnand %p2142_p13, %p3007_p3  ;;  %s3026_s7 = sld [smem:[#allocation19_spill]] }
  0x20   : > { %s3025_s15 = scalar_select %p2524_p7, 1, 0 }
  0x21   : > { %p2203_p9 = pneg %p2517_p2 }
  0x25   : > { %s2201_s14 = scalar_lea.hbm %s3026_s7, 128 }
  0x26   : > { %p2202_p8 = scmp.ne.s32.totalorder %s3026_s7, %s2201_s14  ;;  %p2208_p0 = scmp.lt.u32.totalorder %s2201_s14, %s3026_s7 }
  0x28   : > { %p2204_p13 = pnand %p2203_p9, %p2202_p8 }
  0x2a   : > { %p2205_p12 = pneg %p2204_p13 }
  0x2c   : > { %p2210_p1 = pnand %p2208_p0, %p2205_p12 }
  0x2e   : > { %2213 = shalt.err (!%p2210_p1)
}
  0x2f   : > { %s2214_s19 = scalar_lea.vmem %s385_s23, 128  ;;  %p2222_p6 = scmp.lt.s32.totalorder %s385_s23, %s385_s23 }
  0x30   : > { %p2215_p3 = scmp.ne.s32.totalorder %s385_s23, %s2214_s19  ;;  %p2223_p5 = scmp.lt.s32.totalorder %s2214_s19, %s2214_s19 }
  0x32   : > { %p2217_p4 = pnand %p2215_p3, %p2203_p9  ;;  %p2224_p11 = por %p2223_p5, %p2222_p6 }
  0x34   : > { %p2218_p10 = pneg %p2217_p4 }
  0x36   : > { %p2225_p7 = pnand %p2224_p11, %p2218_p10 }
  0x38   : > { %2228 = shalt.err (!%p2225_p7)
}
  0x39   : > { %2145 = dma.hbm_to_vmem [thread:$0]  (!%p2517_p2), %s3026_s7, 128, %s385_s23, [#allocation6]  }
  0x3a   : > { %s1635_s13 = sshll.u32 %s2363_s28, 7  ;;  %s414_s27 = scalar_lea.vmem [#allocation2], %s1634_s16 }
  0x3b   : > { %s421_s14 = sshll.u32 %s414_s27, 4  ;;  %s2549_s22 = scalar_lea.hbm %s2985_s0, %s1635_s13  ;;  %s2551_s14 = int_to_ptr.vmem [resolvable:$true] %s421_s14 }
  0x3c   : > { %p3027_p3 = scmp.ne.s32.totalorder %s3025_s15, 0  ;;  %p3028_p5 = scmp.lt.s32.totalorder %s2363_s28, 2 }
  0x3d   : > { %s1636_s23 = sshll.u32 %s2513_s24, 4  ;;  %s428_s16 = sand.u32 1, %s2363_s28  }
  0x3e   : > { %p2557_p6 = pnand %p3028_p5, %p3027_p3  ;;  %s2563_s25 = scalar_lea.vmem [#allocation5], %s1636_s23 }
  0x3f   : > { %s439_s17 = sshll.u32 %s2563_s25, 4  ;;  %s411_s13 = scalar_lea.sflag [#allocation3], %s2513_s24  ;;  %s2594_s17 = int_to_ptr.vmem [resolvable:$true] %s439_s17 }
  0x40   : > { %s2229_s27 = scalar_lea.hbm %s2549_s22, 128  ;;  %p2231_p11 = pneg %p2557_p6 }
  0x41   : > { %p2230_p10 = scmp.ne.s32.totalorder %s2549_s22, %s2229_s27  ;;  %s2234_s19 = scalar_lea.hbm %s2985_s0, 256 }
  0x42   : > { %p2235_p2 = scmp.lt.u32.totalorder %s2549_s22, %s2985_s0  ;;  %p2236_p7 = scmp.lt.u32.totalorder %s2234_s19, %s2229_s27 }
  0x43   : > { %p2232_p12 = pnand %p2231_p11, %p2230_p10  ;;  %p2238_p9 = scmp.lt.u32.totalorder %s2229_s27, %s2549_s22 }
  0x44   : > { %p2237_p8 = por %p2236_p7, %p2235_p2 }
  0x45   : > { %p2233_p4 = pneg %p2232_p12 }
  0x46   : > { %p2239_p13 = por %p2238_p9, %p2237_p8 }
  0x48   : > { %p2240_p0 = pnand %p2239_p13, %p2233_p4 }
  0x4a   : > { %2243 = shalt.err (!%p2240_p0)
}
  0x4b   : > { %s2244_s24 = scalar_lea.vmem %s2551_s14, 128  ;;  %s2366_s23 = smov [#allocation2]  }
  0x4c   : > { %p2245_p1 = scmp.ne.s32.totalorder %s2551_s14, %s2244_s24  ;;  %s2249_s15 = sshll.u32 %s2366_s23, 4  ;;  %s2250_s15 = int_to_ptr.vmem [resolvable:$false] %s2249_s15 }
  0x4d   : > { %s2251_s7 = scalar_lea.vmem %s2250_s15, 256  ;;  %p2252_p10 = scmp.lt.s32.totalorder %s2551_s14, %s2250_s15 }
  0x4e   : > { %p2247_p3 = pnand %p2245_p1, %p2231_p11  ;;  %p2253_p12 = scmp.lt.s32.totalorder %s2251_s7, %s2244_s24 }
  0x50   : > { %p2248_p5 = pneg %p2247_p3  ;;  %p2254_p2 = por %p2253_p12, %p2252_p10 }
  0x52   : > { %p2255_p7 = pnand %p2254_p2, %p2248_p5 }
  0x54   : > { %2258 = shalt.err (!%p2255_p7)
}
  0x55   : > { %2149 = dma.hbm_to_vmem [thread:$0]  (!%p2557_p6), %s2549_s22, 128, %s2551_s14, %s411_s13  }
  0x56   : > { %s1662_s12 = sshll.u32 %s2363_s28, 8  ;;  %s2604_s24 = scalar_lea.sflag [#allocation6], %s428_s16 }
  0x57   : > { %s2600_s19 = scalar_lea.hbm %s2986_s1, %s1662_s12  ;;  %s2264_s25 = scalar_lea.hbm %s2986_s1, 512 }
  0x58   : > { %s2259_s23 = scalar_lea.hbm %s2600_s19, 256  ;;  %p2265_p13 = scmp.lt.u32.totalorder %s2600_s19, %s2986_s1 }
  0x59   : > { %p2260_p4 = scmp.ne.s32.totalorder %s2600_s19, %s2259_s23  ;;  %p2266_p0 = scmp.lt.u32.totalorder %s2264_s25, %s2259_s23 }
  0x5a   : > { %p2268_p3 = scmp.lt.u32.totalorder %s2259_s23, %s2600_s19 }
  0x5b   : > { %p2262_p8 = pnand %p2260_p4, %p2231_p11  ;;  %p2267_p1 = por %p2266_p0, %p2265_p13 }
  0x5d   : > { %p2263_p9 = pneg %p2262_p8  ;;  %p2269_p5 = por %p2268_p3, %p2267_p1 }
  0x5f   : > { %p2270_p10 = pnand %p2269_p5, %p2263_p9 }
  0x61   : > { %2273 = shalt.err (!%p2270_p10)
}
  0x62   : > { %s2274_s16 = scalar_lea.vmem %s2594_s17, 256  ;;  %s2367_s7 = smov [#allocation5]  }
  0x63   : > { %p2275_p12 = scmp.ne.s32.totalorder %s2594_s17, %s2274_s16  ;;  %s2279_s12 = sshll.u32 %s2367_s7, 4  ;;  %s2280_s12 = int_to_ptr.vmem [resolvable:$false] %s2279_s12 }
  0x64   : > { %s2281_s27 = scalar_lea.vmem %s2280_s12, 512  ;;  %p2282_p4 = scmp.lt.s32.totalorder %s2594_s17, %s2280_s12 }
  0x65   : > { %p2277_p2 = pnand %p2275_p12, %p2231_p11  ;;  %p2283_p8 = scmp.lt.s32.totalorder %s2281_s27, %s2274_s16 }
  0x67   : > { %p2278_p7 = pneg %p2277_p2  ;;  %p2284_p13 = por %p2283_p8, %p2282_p4 }
  0x69   : > { %p2285_p0 = pnand %p2284_p13, %p2278_p7 }
  0x6b   : > { %2288 = shalt.err (!%p2285_p0)
}
  0x6c   : > { %s2368_s20 = smov 128   ;;  %s2369_s23 = smov 8  }
  0x6d   : > { %2152 = dma.hbm_to_vmem [thread:$0]  (!%p2557_p6), %s2600_s19, 256, %s2594_s17, %s2604_s24, %s2368_s20, %s2368_s20, %s2369_s23  }
  0x6e   : > { %p3030_p11 = scmp.ne.s32.totalorder %s3023_s21, 0 }
  0x6f   : > { %s2633_s14 = sand.u32 (!%p3030_p11), 1, %s2355_s26   ;;  %p3031_p9 = scmp.ne.s32.totalorder (!%p3030_p11), %s3018_s18, 0 }
  0x70   : > { %488 = sbr.rel (%p3030_p11) target bundleno = 1725 (0x6bd), region = 72  ;;  %s1640_s22 = sshll.u32 (!%p3030_p11), %s2633_s14, 3 }
  0x71   : > { %s491_s25 = scalar_lea.sflag (!%p3030_p11), [#allocation3], %s2633_s14  ;;  %s2637_s13 = scalar_lea.vmem (!%p3030_p11), [#allocation2], %s1640_s22 }
  0x77   : > { %2334 = dma.done.wait (%p3031_p9), %s491_s25, 128  }
  0x78   : > { %2336 = vsyncadd (%p3031_p9), %s491_s25, 4294967168  ;;  %s499_s21 = sand.u32 1, %s2466_s29   ;;  %s1641_s30 = sshll.u32 %s2633_s14, 4 }
  0x79   : > { %s500_s17 = scalar_lea.sflag [#allocation6], %s499_s21  ;;  %s2645_s19 = scalar_lea.vmem [#allocation5], %s1641_s30 }
  0x7a   : > { %2338 = dma.done.wait (%p3031_p9), %s500_s17, 256  }
  0x7b   : > { %2340 = vsyncadd (%p3031_p9), %s500_s17, 4294967040  ;;  %p3032_p6 = scmp.eq.s32.totalorder %s2466_s29, 0 }
  0x7d   : > { %2342 = dma.done.wait (%p3032_p6), [#allocation6], 128   ;;  %p3033_p1 = pmov %p3032_p6 }
  0x7e   : > { %v617_v0 = vld [vmem:[%s2993_s8] sm:$0xff]  ;;  %v618_v1 = vld [vmem:[%s2993_s8 + $0x8] sm:$0xff]  ;;  %v619_v2 = vld [vmem:[%s2993_s8 + $0x10] sm:$0xff]  ;;  %p576_p3 = scmp.lt.s32.totalorder %s2466_s29, 1  ;;  %vm710_vm0 = vcmask 64512   ;;  %vm796_vm1 = vcmask 130048  }
  0x7f   : > { %2344 = vsyncadd (%p3033_p1), [#allocation6], 4294967168  ;;  %v1975_v3 = vpack.c.bf16 %v618_v1, %v617_v0  ;;  %v620_v4 = vld [vmem:[%s2993_s8 + $0x18] sm:$0xff]  ;;  %v621_v6 = vld [vmem:[%s2993_s8 + $0x20] sm:$0xff]  ;;  %vm2371_vm2 = vmmov 0   ;;  %s1460_s15 = scalar_lea.sflag [#allocation4], %s2633_s14 }
  0x80   : > { %v1979_v5 = vpack.c.bf16 %v620_v4, %v619_v2  ;;  %v622_v7 = vld [vmem:[%s2993_s8 + $0x28] sm:$0xff]  ;;  %v615_v9 = vld [vmem:[%s2645_s19] sm:$0xff]  ;;  %v624_v11 = vld [vmem:[%s2993_s8 + $0x38] sm:$0xff]  ;;  %s2707_s12 = scalar_select %p576_p3, %s2466_s29, 1 }
  0x81   : > { %1976 = vmatprep.subr.bf16.mxu0 %v1975_v3  ;;  %v1983_v8 = vpack.c.bf16 %v622_v7, %v621_v6  ;;  %v623_v10 = vld [vmem:[%s2993_s8 + $0x30] sm:$0xff]  ;;  %1801 = vmatprep.mubr.f32.mxu0 %v615_v9  ;;  %v625_v13 = vld [vmem:[%s2993_s8 + $0x40] sm:$0xff]  ;;  %v626_v14 = vld [vmem:[%s2993_s8 + $0x48] sm:$0xff] }
  0x82   : > { %1978 = vmatpush3.bf16.msra.mxu0 %v1975_v3  ;;  %v1987_v12 = vpack.c.bf16 %v624_v11, %v623_v10  ;;  %v1991_v15 = vpack.c.bf16 %v626_v14, %v625_v13  ;;  %v627_v16 = vld [vmem:[%s2993_s8 + $0x50] sm:$0xff]  ;;  %v628_v17 = vld [vmem:[%s2993_s8 + $0x58] sm:$0xff]  ;;  %v629_v19 = vld [vmem:[%s2993_s8 + $0x60] sm:$0xff]  ;;  %s1663_s27 = sshll.u32 %s2707_s12, 4  ;;  %v2370_v13 = vmov 0.0|0.0   ;;  %v2372_v14 = vmov 0.0  }
  0x83   : > { %1980 = vmatprep.subr.bf16.mxu0 %v1979_v5  ;;  %v1995_v18 = vpack.c.bf16 %v628_v17, %v627_v16  ;;  %v630_v20 = vld [vmem:[%s2993_s8 + $0x68] sm:$0xff]  ;;  %v631_v22 = vld [vmem:[%s2993_s8 + $0x70] sm:$0xff]  ;;  %v632_v23 = vld [vmem:[%s2993_s8 + $0x78] sm:$0xff]  ;;  %s580_s23 = scalar_lea.vmem %s2987_s2, %s1663_s27  ;;  %s2720_s25 = scalar_lea.vmem %s2988_s3, %s1663_s27 }
  0x84   : > { %v1999_v21 = vpack.c.bf16 %v630_v20, %v629_v19  ;;  %v2003_v24 = vpack.c.bf16 %v632_v23, %v631_v22  ;;  %v616_v25 = vld [vmem:[%s2645_s19 + $0x8] sm:$0xff]  ;;  %v2710_v26 = vld [vmem:[#allocation7] sm:$0xff]  ;;  %v708_v27 = vld [vmem:[%s580_s23] sm:$0xff]  ;;  %s2853_s20 = sshll.u32 %s2707_s12, 3  ;;  %s1659_s19 = sshll.u32 %s2466_s29, 4 }
  0x85   : > { %1804 = vmatprep.subr.mxu1 %v2710_v26  ;;  %v709_v28 = vld [vmem:[%s580_s23 + $0x8] sm:$0xff]  ;;  %1806 = vmatprep.mubr.msk.f32.mxu1 %vm710_vm0, %v708_v27  ;;  %v2725_v29 = vld [vmem:[%s2720_s25] sm:$0xff]  ;;  %v600_v33 = vld [vmem:[%s2994_s9 + $0x10] sm:$0xff]  ;;  %s593_s22 = scalar_lea.vmem %s2990_s5, %s2853_s20  ;;  %s589_s30 = scalar_lea.vmem %s2989_s4, %s2853_s20 }
  0x86   : > { %1982 = vmatpush3.bf16.msra.mxu0 %v1979_v5  ;;  %1805 = vmatpush3.msra.mxu1 %v2710_v26  ;;  %v598_v30 = vld [vmem:[%s2994_s9] sm:$0xff]  ;;  %v599_v31 = vld [vmem:[%s2994_s9 + $0x8] sm:$0xff]  ;;  %v601_v34 = vld [vmem:[%s2994_s9 + $0x18] sm:$0xff]  ;;  %s597_s27 = scalar_lea.vmem %s2991_s6, %s2853_s20  ;;  %s3035_s20 = sld [smem:[#allocation17_spill]] }
  0x87   : > { %1984 = vmatprep.subr.bf16.mxu0 %v1983_v8  ;;  %1807 = vmatmul.mubr.msk.f32.vlgmr.msra.gmra.mrb[0].mxu1 %vm710_vm0, %v709_v28  ;;  %v2011_v32 = vpack.c.bf16 %v599_v31, %v598_v30  ;;  %v2015_v35 = vpack.c.bf16 %v601_v34, %v600_v33  ;;  %v602_v36 = vld [vmem:[%s2994_s9 + $0x20] sm:$0xff]  ;;  %v603_v37 = vld [vmem:[%s2994_s9 + $0x28] sm:$0xff]  ;;  %v604_v39 = vld [vmem:[%s2994_s9 + $0x30] sm:$0xff]  ;;  %s2374_s29 = smov [#allocation8]  }
  0x88   : > { %1813 = vmatprep.mubr.msk.f32.mxu1 %vm796_vm1, %v2725_v29  ;;  %v2019_v38 = vpack.c.bf16 %v603_v37, %v602_v36  ;;  %v605_v40 = vld [vmem:[%s2994_s9 + $0x38] sm:$0xff]  ;;  %v606_v42 = vld [vmem:[%s2994_s9 + $0x40] sm:$0xff]  ;;  %v607_v43 = vld [vmem:[%s2994_s9 + $0x48] sm:$0xff]  ;;  %s2293_s7 = sshll.u32 %s2374_s29, 4  ;;  %s2294_s7 = int_to_ptr.vmem [resolvable:$false] %s2293_s7 }
  0x89   : > { %v2023_v41 = vpack.c.bf16 %v605_v40, %v604_v39  ;;  %v2027_v44 = vpack.c.bf16 %v607_v43, %v606_v42  ;;  %v608_v45 = vld [vmem:[%s2994_s9 + $0x50] sm:$0xff]  ;;  %v609_v46 = vld [vmem:[%s2994_s9 + $0x58] sm:$0xff]  ;;  %v610_v48 = vld [vmem:[%s2994_s9 + $0x60] sm:$0xff] }
  0x8a   : > { %1986 = vmatpush3.bf16.msra.mxu0 %v1983_v8  ;;  %v2031_v47 = vpack.c.bf16 %v609_v46, %v608_v45  ;;  %v611_v49 = vld [vmem:[%s2994_s9 + $0x68] sm:$0xff]  ;;  %v612_v59 = vld [vmem:[%s2994_s9 + $0x70] sm:$0xff]  ;;  %v613_v60 = vld [vmem:[%s2994_s9 + $0x78] sm:$0xff] }
  0x8b   : > { %1988 = vmatprep.subr.bf16.mxu0 %v1987_v12  ;;  %v2035_v50 = vpack.c.bf16 %v611_v49, %v610_v48  ;;  %v793_v56 = vld [vmem:[%s2720_s25 + $0x8] sm:$0xff]  ;;  %v2039_v61 = vpack.c.bf16 %v613_v60, %v612_v59  ;;  %v1267_v19 = vld [vmem:[%s2995_s10 + $0x18] sm:$0xff]  ;;  %v1272_v28 = vld [vmem:[%s2995_s10 + $0x40] sm:$0xff]  ;;  %s3036_s25 = sld [smem:[#allocation21_spill]] }
  0x8c   : > { %v1265_v16 = vld [vmem:[%s2995_s10 + $0x8] sm:$0xff]  ;;  %v1274_v31 = vld [vmem:[%s2995_s10 + $0x50] sm:$0xff]  ;;  %v1276_v34 = vld [vmem:[%s2995_s10 + $0x60] sm:$0xff]  ;;  %p3038_p10 = scmp.ne.s32.totalorder %s3035_s20, 0 }
  0x8d   : > { %v1269_v22 = vld [vmem:[%s2995_s10 + $0x28] sm:$0xff]  ;;  %v1278_v37 = vld [vmem:[%s2995_s10 + $0x70] sm:$0xff]  ;;  %v1280_v48 = vld [vmem:[%s2996_s11] sm:$0xff] }
  0x8e   : > { %1990 = vmatpush3.bf16.msra.mxu0 %v1987_v12  ;;  %v1281_v49 = vld [vmem:[%s2996_s11 + $0x8] sm:$0xff]  ;;  %v1288_v60 = vld [vmem:[%s2996_s11 + $0x40] sm:$0xff] }
  0x8f   : > { %1992 = vmatprep.subr.bf16.mxu0 %v1991_v15 }
  0x91   : > { %s3037_s17 = smov %s3036_s25  ;;  %s2941_s24 = scalar_lea.hbm %s3036_s25, %s1659_s19 }
  0x92   : > { %1994 = vmatpush3.bf16.msra.mxu0 %v1991_v15  ;;  %v1264_v15 = vld [vmem:[%s2995_s10] sm:$0xff] }
  0x93   : > { %1996 = vmatprep.subr.bf16.mxu0 %v1995_v18  ;;  %v2107_v17 = vpack.c.bf16 %v1265_v16, %v1264_v15 }
  0x96   : > { %1998 = vmatpush3.bf16.msra.mxu0 %v1995_v18  ;;  %v1266_v18 = vld [vmem:[%s2995_s10 + $0x10] sm:$0xff] }
  0x97   : > { %2000 = vmatprep.subr.bf16.mxu0 %v1999_v21  ;;  %v2110_v20 = vpack.c.bf16 %v1267_v19, %v1266_v18 }
  0x9a   : > { %2002 = vmatpush3.bf16.msra.mxu0 %v1999_v21  ;;  %v1268_v21 = vld [vmem:[%s2995_s10 + $0x20] sm:$0xff] }
  0x9b   : > { %2004 = vmatprep.subr.bf16.mxu0 %v2003_v24  ;;  %v2113_v23 = vpack.c.bf16 %v1269_v22, %v1268_v21 }
  0x9e   : > { %2006 = vmatpush3.bf16.msra.mxu0 %v2003_v24  ;;  %v1270_v24 = vld [vmem:[%s2995_s10 + $0x30] sm:$0xff] }
  0x9f   : > { %2048 = vmatprep.subr.bf16.mxu0 %v2011_v32 }
  0xa1   : > { %1802 = vmatmul.mubr.f32.vlgmr.msra.gmra.mrb[0].mxu0 %v616_v25  ;;  %v1271_v25 = vld [vmem:[%s2995_s10 + $0x38] sm:$0xff] }
  0xa2   : > { %2050 = vmatpush3.bf16.msra.mxu0 %v2011_v32  ;;  %v2116_v27 = vpack.c.bf16 %v1271_v25, %v1270_v24 }
  0xa3   : > { %2052 = vmatprep.subr.bf16.mxu0 %v2015_v35 }
  0xa6   : > { %2054 = vmatpush3.bf16.msra.mxu0 %v2015_v35 }
  0xa7   : > { %2056 = vmatprep.subr.bf16.mxu0 %v2019_v38 }
  0xaa   : > { %2058 = vmatpush3.bf16.msra.mxu0 %v2019_v38 }
  0xab   : > { %2060 = vmatprep.subr.bf16.mxu0 %v2023_v41 }
  0xae   : > { %2062 = vmatpush3.bf16.msra.mxu0 %v2023_v41 }
  0xaf   : > { %2064 = vmatprep.subr.bf16.mxu0 %v2027_v44 }
  0xb2   : > { %2066 = vmatpush3.bf16.msra.mxu0 %v2027_v44 }
  0xb3   : > { %2068 = vmatprep.subr.bf16.mxu0 %v2031_v47 }
  0xb6   : > { %2070 = vmatpush3.bf16.msra.mxu0 %v2031_v47 }
  0xb7   : > { %2072 = vmatprep.subr.bf16.mxu0 %v2035_v50 }
  0xba   : > { %2074 = vmatpush3.bf16.msra.mxu0 %v2035_v50 }
  0xbb   : > { %2076 = vmatprep.subr.bf16.mxu0 %v2039_v61 }
  0xbe   : > { %2078 = vmatpush3.bf16.msra.mxu0 %v2039_v61 }
  0xbf   : > { %2106 = vmatprep.subr.bf16.mxu0 %v2370_v13 }
 0x15a   : > { %v1808_v57 = vpop.f32.mrb[0].mxu1 }
 0x15b   : > { %v783_v58 = vpop.f32.mrb[1].mxu1 }
 0x174   : > { %v2771_v51 = vpop.f32.mrb[0].mxu0 }
 0x175   : > { %v795_v52 = vmax.f32 %v2771_v51, 0.0  ;;  %v2774_v53 = vpop.f32.mrb[1].mxu0 }
 0x176   : > { %v794_v54 = vmax.f32 %v2774_v53, 0.0 }
 0x178   : > { %v2007_v55 = vpack.c.bf16 %v795_v52, %v794_v54  ;;  %v1283_v52 = vld [vmem:[%s2996_s11 + $0x18] sm:$0xff]  ;;  %v1284_v54 = vld [vmem:[%s2996_s11 + $0x20] sm:$0xff] }
 0x17a   : > { %2008 = vmatprep.subr.bf16.mxu1 %v2007_v55 }
 0x17b   : > { %2010 = vmatpush3.bf16.msra.mxu1 %v2007_v55  ;;  %v1285_v55 = vld [vmem:[%s2996_s11 + $0x28] sm:$0xff] }
 0x17c   : > { %2012 = vmatprep.subr.bf16.mxu1 %v2011_v32 }
 0x17e   : > { %1814 = vmatmul.mubr.msk.f32.vlgmr.msra.gmra.mrb[2].mxu1 %vm796_vm1, %v793_v56 }
 0x17f   : > { %2014 = vmatpush3.bf16.msra.mxu1 %v2011_v32  ;;  %v1275_v32 = vld [vmem:[%s2995_s10 + $0x58] sm:$0xff] }
 0x180   : > { %2016 = vmatprep.subr.bf16.mxu1 %v2015_v35  ;;  %v2122_v33 = vpack.c.bf16 %v1275_v32, %v1274_v31 }
 0x183   : > { %2018 = vmatpush3.bf16.msra.mxu1 %v2015_v35  ;;  %v1277_v35 = vld [vmem:[%s2995_s10 + $0x68] sm:$0xff] }
 0x184   : > { %2020 = vmatprep.subr.bf16.mxu1 %v2019_v38  ;;  %v2125_v36 = vpack.c.bf16 %v1277_v35, %v1276_v34 }
 0x187   : > { %2022 = vmatpush3.bf16.msra.mxu1 %v2019_v38  ;;  %v1279_v38 = vld [vmem:[%s2995_s10 + $0x78] sm:$0xff] }
 0x188   : > { %2024 = vmatprep.subr.bf16.mxu1 %v2023_v41  ;;  %v2128_v39 = vpack.c.bf16 %v1279_v38, %v1278_v37 }
 0x18b   : > { %2026 = vmatpush3.bf16.msra.mxu1 %v2023_v41 }
 0x18c   : > { %2028 = vmatprep.subr.bf16.mxu1 %v2027_v44 }
 0x18f   : > { %2030 = vmatpush3.bf16.msra.mxu1 %v2027_v44 }
 0x190   : > { %2032 = vmatprep.subr.bf16.mxu1 %v2031_v47 }
 0x193   : > { %2034 = vmatpush3.bf16.msra.mxu1 %v2031_v47  ;;  %v1116_v47 = vld [vmem:[%s593_s22] sm:$0xff]  ;;  %s575_s22 = scalar_lea.vmem [#allocation8], %s2633_s14 }
 0x194   : > { %2036 = vmatprep.subr.bf16.mxu1 %v2035_v50  ;;  %s1472_s12 = sshll.u32 %s575_s22, 4  ;;  %s2943_s12 = int_to_ptr.vmem [resolvable:$true] %s1472_s12 }
 0x195   : > { %s2289_s16 = scalar_lea.vmem %s2943_s12, 16  ;;  %p2296_p7 = scmp.lt.s32.totalorder %s2943_s12, %s2294_s7 }
 0x196   : > { %p2290_p5 = scmp.ne.s32.totalorder %s2943_s12, %s2289_s16 }
 0x197   : > { %2038 = vmatpush3.bf16.msra.mxu1 %v2035_v50  ;;  %v1115_v50 = vld [vmem:[%s589_s30] sm:$0xff] }
 0x198   : > { %2040 = vmatprep.subr.bf16.mxu1 %v2039_v61  ;;  %p2291_p12 = pnand %p2290_p5, %p3038_p10 }
 0x19a   : > { %p2292_p2 = pneg %p2291_p12 }
 0x19b   : > { %2042 = vmatpush3.bf16.msra.mxu1 %v2039_v61  ;;  %v1289_v61 = vld [vmem:[%s2996_s11 + $0x48] sm:$0xff] }
 0x251   : > { %v1815_v62 = vpop.f32.mrb[2].mxu1 }
 0x252   : > { %v879_v63 = vadd.f32 %v1815_v62, %v1808_v57  ;;  %v869_v0 = vpop.f32.mrb[3].mxu1  ;;  %v2095_v62 = vpack.c.bf16 %v1289_v61, %v1288_v60 }
 0x253   : > { %v878_v1 = vadd.f32 %v869_v0, %v783_v58  ;;  %v1291_v0 = vld [vmem:[%s2996_s11 + $0x58] sm:$0xff] }
 0x255   : > { %1848 = vmatprep.mubr.f32.mxu1 %v878_v1 }
 0x256   : > { %1849 = vmatmul.mubr.f32.vlgmr.msra.gmra.mrb[4].mxu1 %v879_v63  ;;  %v1290_v63 = vld [vmem:[%s2996_s11 + $0x50] sm:$0xff] }
 0x257   : > { %1855 = vmatprep.mubr.msk.f32.mxu1 %vm796_vm1, %v2725_v29  ;;  %v1273_v29 = vld [vmem:[%s2995_s10 + $0x48] sm:$0xff]  ;;  %v2098_v1 = vpack.c.bf16 %v1291_v0, %v1290_v63 }
 0x258   : > { %v2119_v30 = vpack.c.bf16 %v1273_v29, %v1272_v28 }
 0x329   : > { %v1850_v2 = vpop.f32.mrb[4].mxu1 }
 0x32a   : > { %v956_v3 = vadd.f32 %v1850_v2, %v2771_v51  ;;  %v946_v4 = vpop.f32.mrb[5].mxu1  ;;  %v1292_v2 = vld [vmem:[%s2996_s11 + $0x60] sm:$0xff] }
 0x32b   : > { %v955_v5 = vadd.f32 %v946_v4, %v2774_v53 }
 0x32c   : > { %v958_v6 = vmax.f32 %v956_v3, 0.0  ;;  %v1293_v3 = vld [vmem:[%s2996_s11 + $0x68] sm:$0xff] }
 0x32d   : > { %v957_v7 = vmax.f32 %v955_v5, 0.0  ;;  %v2101_v4 = vpack.c.bf16 %v1293_v3, %v1292_v2  ;;  %v1294_v5 = vld [vmem:[%s2996_s11 + $0x70] sm:$0xff] }
 0x32f   : > { %v2043_v8 = vpack.c.bf16 %v958_v6, %v957_v7  ;;  %v1295_v6 = vld [vmem:[%s2996_s11 + $0x78] sm:$0xff] }
 0x330   : > { %v2104_v7 = vpack.c.bf16 %v1295_v6, %v1294_v5 }
 0x331   : > { %2044 = vmatprep.subr.bf16.mxu1 %v2043_v8 }
 0x332   : > { %2046 = vmatpush3.bf16.msra.mxu1 %v2043_v8  ;;  %v1263_v8 = vld [vmem:[%s2637_s13] sm:$0xff]  ;;  %s3034_s13 = sld [smem:[#allocation20_spill]] }
 0x333   : > { %2079 = vmatprep.subr.bf16.mxu1 %v2370_v13 }
 0x335   : > { %1856 = vmatmul.mubr.msk.f32.vlgmr.msra.gmra.mrb[6].mxu1 %vm796_vm1, %v793_v56  ;;  %v2089_v56 = vpack.c.bf16 %v1285_v55, %v1284_v54 }
 0x336   : > { %1897 = vmatprep.mubr.msk.f32.mxu1 %vm2371_vm2, %v2372_v14 }
 0x408   : > { %v1857_v9 = vpop.f32.mrb[6].mxu1 }
 0x409   : > { %v1035_v10 = vadd.f32 %v1857_v9, %v1808_v57  ;;  %v1025_v11 = vpop.f32.mrb[7].mxu1  ;;  %v1286_v57 = vld [vmem:[%s2996_s11 + $0x30] sm:$0xff]  ;;  %v2373_v9 = vmov 0  }
 0x40a   : > { %v1034_v12 = vadd.f32 %v1025_v11, %v783_v58  ;;  %v1287_v58 = vld [vmem:[%s2996_s11 + $0x38] sm:$0xff]  ;;  %2200 = vset.pattern.permute.xlu0 %v2373_v9 }
 0x40b   : > { %v2092_v59 = vpack.c.bf16 %v1287_v58, %v1286_v57 }
 0x40c   : > { %1890 = vmatprep.mubr.f32.mxu0 %v1034_v12 }
 0x40d   : > { %1891 = vmatmul.mubr.f32.vlgmr.msra.gmra.mrb[2].mxu0 %v1035_v10  ;;  %v1445_v10 = vld [vmem:[%s597_s27] sm:$0xff]  ;;  %s2295_s27 = scalar_lea.vmem %s2294_s7, 32 }
 0x40e   : > { %1972 = vmatprep.mubr.msk.f32.mxu0 %vm2371_vm2, %v2372_v14  ;;  %2108 = vmatpush3.bf16.msra.mxu0 %v2107_v17  ;;  %p2297_p4 = scmp.lt.s32.totalorder %s2295_s27, %s2289_s16 }
 0x40f   : > { %2109 = vmatprep.subr.bf16.mxu0 %v2370_v13  ;;  %1448 = vperm.xlu0 %2200, %v1445_v10  }
 0x410   : > { %p2298_p8 = por %p2297_p4, %p2296_p7 }
 0x412   : > { %2111 = vmatpush3.bf16.msra.mxu0 %v2110_v20  ;;  %p2299_p13 = pnand %p2298_p8, %p2292_p2 }
 0x413   : > { %2112 = vmatprep.subr.bf16.mxu0 %v2370_v13 }
 0x416   : > { %2114 = vmatpush3.bf16.msra.mxu0 %v2113_v23 }
 0x417   : > { %2115 = vmatprep.subr.bf16.mxu0 %v2370_v13 }
 0x41a   : > { %2117 = vmatpush3.bf16.msra.mxu0 %v2116_v27 }
 0x41b   : > { %2118 = vmatprep.subr.bf16.mxu0 %v2370_v13 }
 0x41e   : > { %2120 = vmatpush3.bf16.msra.mxu0 %v2119_v30 }
 0x41f   : > { %2121 = vmatprep.subr.bf16.mxu0 %v2370_v13 }
 0x422   : > { %2123 = vmatpush3.bf16.msra.mxu0 %v2122_v33 }
 0x423   : > { %2124 = vmatprep.subr.bf16.mxu0 %v2370_v13 }
 0x426   : > { %2126 = vmatpush3.bf16.msra.mxu0 %v2125_v36 }
 0x427   : > { %2127 = vmatprep.subr.bf16.mxu0 %v2370_v13 }
 0x42a   : > { %2129 = vmatpush3.bf16.msra.mxu0 %v2128_v39 }
 0x42d   : > { %1973 = vmatmul.mubr.f32.vlgmr.msra.gmra.mrb[4].mxu0 %v1263_v8 }
 0x48e   : > { %v1449_v20 = vpop.permute.xlu0 %1448 }
 0x4e0   : > { %v1892_v40 = vpop.f32.mrb[2].mxu0 }
 0x4e1   : > { %v1112_v41 = vadd.f32 %v1892_v40, %v2771_v51  ;;  %v1102_v42 = vpop.f32.mrb[3].mxu0  ;;  %v2083_v51 = vpack.c.bf16 %v1281_v49, %v1280_v48 }
 0x4e2   : > { %v1111_v43 = vadd.f32 %v1102_v42, %v2774_v53 }
 0x4e3   : > { %v1114_v44 = vmax.f32 %v1112_v41, 0.0 }
 0x4e4   : > { %v1113_v45 = vmax.f32 %v1111_v43, 0.0 }
 0x4e6   : > { %v2080_v46 = vpack.c.bf16 %v1114_v44, %v1113_v45 }
 0x4e8   : > { %2081 = vmatpush3.bf16.msra.mxu1 %v2080_v46 }
 0x4e9   : > { %1900 = vmatprep.subr.mxu1 %v2372_v14 }
 0x4eb   : > { %1898 = vmatmul.mubr.msk.f32.vlgmr.msra.gmra.mrb[8].mxu1 %vm796_vm1, %v1116_v47 }
 0x4ec   : > { %1901 = vmatpush3.msra.mxu1 %v2710_v26  ;;  %1902 = vmatprep.mubr.msk.f32.mxu1 %vm2371_vm2, %v2372_v14  ;;  %v1282_v26 = vld [vmem:[%s2996_s11 + $0x10] sm:$0xff] }
 0x4ed   : > { %2082 = vmatprep.subr.bf16.mxu1 %v2370_v13  ;;  %v2086_v53 = vpack.c.bf16 %v1283_v52, %v1282_v26 }
 0x4f3   : > { %1903 = vmatmul.mubr.msk.f32.vlgmr.msra.gmra.mrb[8].mxu1 %vm710_vm0, %v1115_v50 }
 0x4f4   : > { %2084 = vmatpush3.bf16.msra.mxu1 %v2083_v51  ;;  %1937 = vmatprep.mubr.msk.f32.mxu1 %vm2371_vm2, %v2372_v14 }
 0x4f5   : > { %2085 = vmatprep.subr.bf16.mxu1 %v2370_v13 }
 0x4f8   : > { %2087 = vmatpush3.bf16.msra.mxu1 %v2086_v53 }
 0x4f9   : > { %2088 = vmatprep.subr.bf16.mxu1 %v2370_v13 }
 0x4fc   : > { %2090 = vmatpush3.bf16.msra.mxu1 %v2089_v56 }
 0x4fd   : > { %2091 = vmatprep.subr.bf16.mxu1 %v2370_v13 }
 0x500   : > { %2093 = vmatpush3.bf16.msra.mxu1 %v2092_v59  ;;  %v1432_v14 = vpop.f32.mrb[4].mxu0 }
 0x501   : > { %2094 = vmatprep.subr.bf16.mxu1 %v2370_v13  ;;  %v1974_v15 = vpop.f32.mrb[5].mxu0 }
 0x504   : > { %2096 = vmatpush3.bf16.msra.mxu1 %v2095_v62 }
 0x505   : > { %2097 = vmatprep.subr.bf16.mxu1 %v2370_v13 }
 0x508   : > { %2099 = vmatpush3.bf16.msra.mxu1 %v2098_v1 }
 0x509   : > { %2100 = vmatprep.subr.bf16.mxu1 %v2370_v13 }
 0x50c   : > { %2102 = vmatpush3.bf16.msra.mxu1 %v2101_v4 }
 0x50d   : > { %2103 = vmatprep.subr.bf16.mxu1 %v2370_v13  ;;  %v1658_v13 = vld [vmem:[%s3034_s13] ss:$0 sm:$0xff] }
 0x510   : > { %2105 = vmatpush3.bf16.msra.mxu1 %v2104_v7 }
 0x5c6   : > { %v1259_v11 = vpop.f32.mrb[8].mxu1 }
 0x5c7   : > { %v1904_v12 = vpop.f32.mrb[9].mxu1  ;;  %1938 = vmatmul.mubr.f32.vlgmr.msra.gmra.mrb[10].mxu1 %v1259_v11 }
 0x69a   : > { %v1362_v16 = vpop.f32.mrb[10].mxu1 }
 0x69b   : > { %v1433_v17 = vadd.f32 %v1432_v14, %v1362_v16  ;;  %v1939_v18 = vpop.f32.mrb[11].mxu1 }
 0x69d   : > { %v1443_v19 = vadd.f32 %v1658_v13, %v1433_v17 }
 0x69f   : > { %v1444_v21 = vmax.f32 %v1443_v19, 0.0 }
 0x6a1   : > { %v1451_v22 = vmul.f32 %v1449_v20, %v1444_v21 }
 0x6a3   : > { %v1452_v23 = vrot.slane %v1451_v22, 4 }
 0x6a5   : > { %v1453_v24 = vadd.f32 %v1452_v23, %v1451_v22 }
 0x6a7   : > { %v1454_v25 = vrot.slane %v1453_v24, 2 }
 0x6a9   : > { %v1455_v27 = vadd.f32 %v1454_v25, %v1453_v24 }
 0x6ab   : > { %v1456_v28 = vrot.slane %v1455_v27, 1 }
 0x6ad   : > { %v1457_v29 = vadd.f32 %v1456_v28, %v1455_v27 }
 0x6af   : > { %1458 = vst [vmem:[%s575_s22] sm:$0x1] %v1457_v29 }
 0x6b0   : > { %2302 = shalt.err (!%p2299_p13)
}
 0x6b1   : > { %s2303_s14 = scalar_lea.hbm %s2941_s24, 16  ;;  %s2307_s13 = scalar_lea.hbm %s3037_s17, 32 }
 0x6b2   : > { %p2304_p0 = scmp.ne.s32.totalorder %s2941_s24, %s2303_s14  ;;  %p2308_p6 = scmp.lt.u32.totalorder %s2941_s24, %s3037_s17 }
 0x6b3   : > { %p2309_p1 = scmp.lt.u32.totalorder %s2307_s13, %s2303_s14  ;;  %p2311_p5 = scmp.lt.u32.totalorder %s2303_s14, %s2941_s24 }
 0x6b4   : > { %p2305_p11 = pnand %p2304_p0, %p3038_p10 }
 0x6b5   : > { %p2310_p3 = por %p2309_p1, %p2308_p6 }
 0x6b6   : > { %p2306_p9 = pneg %p2305_p11 }
 0x6b7   : > { %p2312_p12 = por %p2311_p5, %p2310_p3 }
 0x6b9   : > { %p2313_p2 = pnand %p2312_p12, %p2306_p9 }
 0x6bb   : > { %2316 = shalt.err (!%p2313_p2)
}
 0x6bc   : > { %2140 = dma.vmem_to_hbm [thread:$0]  (%p3038_p10), %s2943_s12, 16, %s2941_s24, %s1460_s15  }
 0x6bd PF: > { %s3039_s21 = sld [smem:[#allocation13_spill]]  ;;  %s3040_s30 = sld [smem:[#allocation18_spill]] }
 0x6be   : > { %p3042_p4 = scmp.ge.s32.totalorder %s2363_s28, 2 }
 0x6c3   : > { %s1484_s25 = sand.u32 1, %s3039_s21   ;;  %p3041_p7 = scmp.ne.s32.totalorder %s3040_s30, 0 }
 0x6c4   : > { %s1485_s16 = scalar_lea.sflag [#allocation4], %s1484_s25 }
 0x6c5   : > { %p2154_p8 = pnand %p3042_p4, %p3041_p7 }
 0x6c7   : > { %2346 = dma.done.wait (!%p2154_p8), %s1485_s16, 16  }
 0x6c8   : > { %2348 = vsyncadd (!%p2154_p8), %s1485_s16, 4294967280  ;;  %s3043_s28 = sld [smem:[#allocation15_spill]]  ;;  %s3044_s29 = sld [smem:[#allocation14_spill]] }
 0x6c9   : > { %s3045_s27 = sld [smem:[#allocation16_spill]]  ;;  %s3046_s25 = smov %s2355_s26 }
 0x6ce   : > { %p29_p13 = scmp.ge.s32.totalorder %s3043_s28, 4   ;;  %s3047_s26 = smov %s3044_s29 }
 0x6d0   :  { %31 = sbr.rel (!%p29_p13) target bundleno = 11 (0xb), region = 149 }
 0x6d7   :  { %1489 = vsyncpa [#allocation3], 1 }
 0x6d8   :  { %1491 = vsyncpa [#allocation3 + $0x1], 1 }
 0x6d9   :  { %1492 = vsyncpa [#allocation6], 1 }
 0x6da   :  { %1494 = vsyncpa [#allocation6 + $0x1], 1 }
 0x6db   :  { %1495 = vsyncpa [#allocation4], 1 }
 0x6dc   :  { %1497 = vsyncpa [#allocation4 + $0x1], 1 }

</bundles_post_ra>
